<compile_context>
chip_gen: v5e
topology: v5e:2x2
jax: 0.10.0
libtpu: 0.0.40
codegen_flags: <defaults>
</compile_context>

<pallas_src>
import functools
import math

import jax
import jax.numpy as jnp
from jax import lax
from jax.experimental import pallas as pl
from jax.experimental.pallas import tpu as pltpu

# Module hyper-parameters (defaults of SigmoidBin.__init__)
BIN_COUNT = 10
LENGTH = BIN_COUNT + 1
VMIN, VMAX = 0.0, 1.0
REG_SCALE = 2.0
USE_FW_REGRESSION = True


def _round_up(x, m):
    return ((x + m - 1) // m) * m


def _cdiv(a, b):
    return -(-a // b)


def make_bins(bin_count=BIN_COUNT, vmin=VMIN, vmax=VMAX):
    # Matches torch.range(start, end + 0.0001, step) for the default params.
    scale = float(vmax - vmin)
    step = scale / bin_count
    start = vmin + scale / (2.0 * bin_count)
    return start + step * jnp.arange(bin_count, dtype=jnp.float32)


def _check_closed_form_bins(bin_count, vmin, vmax):
    # Regression check (review concern): torch.range(start, end+1e-4, step)
    # must yield exactly bin_count values for bins[i] == start + i*step.
    scale = float(vmax - vmin)
    step = scale / bin_count
    start = vmin + scale / (2.0 * bin_count)
    end = vmax - scale / (2.0 * bin_count)
    assert start + (bin_count - 1) * step <= end + 1e-4 + 1e-9, "too few bins"
    assert start + bin_count * step > end + 1e-4, "closed-form bins would miss an extra bin"


def _sigmoid_bin_kernel(pred_ref, out_ref, *, reg_mul, reg_add, step, bin_start,
                        vmin, vmax, use_fw_regression, transpose_in_kernel):
    # transpose_in_kernel=True : pred_ref block is (TILE_N, length) (row-major input)
    # transpose_in_kernel=False: pred_ref block is (length, TILE_N) (channel-major input)
    x = pred_ref[...].astype(jnp.float32)
    xt = x.T if transpose_in_kernel else x                     # (length, TILE_N)

    ridx = lax.broadcasted_iota(jnp.int32, xt.shape, 0)        # channel index per row
    is_bin = ridx >= 1                                         # rows 1..bin_count are bin logits

    # Max bin logit per column (sublane reduce over <=16 rows — cheap VALU/XLU).
    bin_logits = jnp.where(is_bin, xt, jnp.float32(-jnp.inf))
    col_max = jnp.max(bin_logits, axis=0, keepdims=True)       # (1, TILE_N)

    # Value-based argmax: bins[i] = bin_start + step*i, row r>=1 holds bin r-1.
    # Bins are strictly increasing, so the min bin value among maximal logits
    # equals bins[first argmax] (same tie-breaking as torch.max).
    bin_value = jnp.float32(step) * ridx.astype(jnp.float32) + jnp.float32(bin_start - step)
    cand = jnp.where(is_bin & (xt == col_max), bin_value, jnp.float32(jnp.inf))
    bin_bias = jnp.min(cand, axis=0, keepdims=True)            # (1, TILE_N)

    if use_fw_regression:
        # (x*reg_scale - reg_scale/2)*step folded to one mul + one add.
        pred_reg = xt[0:1, :] * jnp.float32(reg_mul) + jnp.float32(reg_add)
        result = pred_reg + bin_bias
    else:
        result = bin_bias

    out_ref[...] = jnp.clip(result, vmin, vmax).astype(out_ref.dtype)


def _tiling(n, max_tile_n):
    """Pick a near-full lane-dense tile; >=2 tiles so v7x can use both TCs."""
    if n <= 1024:
        return n, 1                       # single full block (dims equal array dims)
    n128 = _round_up(n, 128)
    max_tile_n = _round_up(max_tile_n, 128)
    num_tiles = max(_cdiv(n128, max_tile_n), 2)
    tile_n = min(_round_up(_cdiv(n128, num_tiles), 128), max_tile_n)
    return tile_n, _cdiv(n, tile_n)


def _compiler_params(tile_n, length, itemsize):
    lane_n = _round_up(tile_n, 128)
    # Row-major input block (TILE_N, length): length lane-pads to 128.
    in_rm = _round_up(tile_n, 8) * 128 * itemsize
    # Channel-major fallback block (length, TILE_N): length sublane-pads to 16.
    in_cm = _round_up(length, 8) * lane_n * itemsize
    out_b = 8 * lane_n * itemsize
    work = 12 * _round_up(length, 8) * lane_n * 4      # f32 intermediates
    vmem = 2 * max(in_rm, in_cm) + 2 * out_b + work + (8 << 20)
    return pltpu.CompilerParams(
        dimension_semantics=("parallel",),
        vmem_limit_bytes=int(min(vmem, 48 << 20)),     # well under v7x's 64 MiB/TC
    )


_IN_KERNEL_TRANSPOSE_OK = True  # flipped off once if Mosaic rejects the fused path


def sigmoid_bin_forward(pred, *, bin_count=BIN_COUNT, reg_scale=REG_SCALE,
                        vmin=VMIN, vmax=VMAX,
                        use_fw_regression=USE_FW_REGRESSION,
                        max_tile_n=16384):
    global _IN_KERNEL_TRANSPOSE_OK
    orig_shape = pred.shape
    length = orig_shape[-1]
    assert length == bin_count + 1, (length, bin_count + 1)
    assert length <= 128
    _check_closed_form_bins(bin_count, vmin, vmax)

    scale = float(vmax - vmin)
    step = scale / bin_count
    bin_start = vmin + scale / (2.0 * bin_count)
    reg_mul = reg_scale * step
    reg_add = -0.5 * reg_scale * step

    n = math.prod(orig_shape[:-1])
    if n == 0:
        return jnp.zeros(orig_shape[:-1], dtype=pred.dtype)

    tile_n, num_tiles = _tiling(n, max_tile_n)
    cparams = _compiler_params(tile_n, length, jnp.dtype(pred.dtype).itemsize)

    kern = functools.partial(
        _sigmoid_bin_kernel, reg_mul=reg_mul, reg_add=reg_add, step=step,
        bin_start=bin_start, vmin=vmin, vmax=vmax,
        use_fw_regression=use_fw_regression)

    pred2d = pred.reshape(n, length)          # row-major: metadata-only reshape
    out_shape = jax.ShapeDtypeStruct((1, n), pred.dtype)
    out_spec = pl.BlockSpec((1, tile_n), lambda i: (0, i))   # lane-dense output

    if _IN_KERNEL_TRANSPOSE_OK:
        try:
            out = pl.pallas_call(
                functools.partial(kern, transpose_in_kernel=True),
                out_shape=out_shape,
                grid_spec=pltpu.PrefetchScalarGridSpec(
                    num_scalar_prefetch=0,
                    grid=(num_tiles,),
                    in_specs=[pl.BlockSpec((tile_n, length), lambda i: (i, 0))],
                    out_specs=out_spec,
                ),
                compiler_params=cparams,
            )(pred2d)
            return out.reshape(orig_shape[:-1])
        except Exception:
            # Mosaic rejected the in-kernel transpose on this config; fall back
            # (once) to the channel-major layout built by XLA.
            _IN_KERNEL_TRANSPOSE_OK = False

    pred_t = pred2d.T                          # fallback only: extra HBM pass
    out = pl.pallas_call(
        functools.partial(kern, transpose_in_kernel=False),
        out_shape=out_shape,
        grid_spec=pltpu.PrefetchScalarGridSpec(
            num_scalar_prefetch=0,
            grid=(num_tiles,),
            in_specs=[pl.BlockSpec((length, tile_n), lambda i: (0, i))],
            out_specs=out_spec,
        ),
        compiler_params=cparams,
    )(pred_t)
    return out.reshape(orig_shape[:-1])


def sigmoid_bin_forward_ref(pred, bins, *, bin_count=BIN_COUNT,
                            reg_scale=REG_SCALE, vmin=VMIN, vmax=VMAX,
                            use_fw_regression=USE_FW_REGRESSION):
    # Pure-JAX reference mirroring the PyTorch forward.
    scale = float(vmax - vmin)
    step = scale / bin_count
    pred_reg = (pred[..., 0] * reg_scale - reg_scale / 2.0) * step
    pred_bin = pred[..., 1:1 + bin_count]
    bin_idx = jnp.argmax(pred_bin, axis=-1)
    bin_bias = bins[bin_idx]
    result = pred_reg + bin_bias if use_fw_regression else bin_bias
    return jnp.clip(result, vmin, vmax)


# TODO(synk): training_loss (BCEWithLogitsLoss / MSELoss path) is not part of
# forward() and is left unimplemented.

if __name__ == "__main__":
    key = jax.random.PRNGKey(0)
    bins = make_bins()

    # Small shape consistent with the module: (..., length) = (2, 8, 11).
    pred = jax.random.normal(key, (2, 8, LENGTH), dtype=jnp.float32)
    out = jax.block_until_ready(sigmoid_bin_forward(pred))
    ref = sigmoid_bin_forward_ref(pred, bins)
    assert out.shape == ref.shape == (2, 8)
    assert jnp.allclose(out, ref, atol=1e-6), (out, ref)

    # Row count that is not a multiple of 8/128 (single partial-shape block).
    pred2 = jax.random.normal(jax.random.PRNGKey(1), (3, 5, LENGTH),
                              dtype=jnp.float32)
    out2 = jax.block_until_ready(sigmoid_bin_forward(pred2))
    ref2 = sigmoid_bin_forward_ref(pred2, bins)
    assert out2.shape == ref2.shape == (3, 5)
    assert jnp.allclose(out2, ref2, atol=1e-6), (out2, ref2)

    # Multi-tile grid with a ragged last block (Pallas partial-block masking).
    pred3 = jax.random.normal(jax.random.PRNGKey(2), (4, 500, LENGTH),
                              dtype=jnp.float32)
    out3 = jax.block_until_ready(sigmoid_bin_forward(pred3, max_tile_n=1024))
    ref3 = sigmoid_bin_forward_ref(pred3, bins)
    assert out3.shape == ref3.shape == (4, 500)
    assert jnp.allclose(out3, ref3, atol=1e-6), (out3, ref3)

    print("KERNEL_OK")
</pallas_src>

<mosaic_0001>
module attributes {stable_mosaic.version = 11 : i64} {
  func.func @_sigmoid_bin_kernel(%arg0: i32, %arg1: memref<16x11xf32, #tpu.memory_space<vmem>>, %arg2: memref<1x16xf32, #tpu.memory_space<vmem>>) attributes {dimension_semantics = [#tpu.dimension_semantics<parallel>], iteration_bounds = array<i64: 1>, scalar_prefetch = 0 : i64, scratch_operands = 0 : i64, tpu.core_type = #tpu.core_type<tc>, window_params = [{transform_indices = @transform_0, window_bounds = array<i64: 16, 11>}, {transform_indices = @transform_1, window_bounds = array<i64: 1, 16>}]} {
    %c0 = arith.constant 0 : index
    %c0_0 = arith.constant 0 : index
    %0 = vector.load %arg1[%c0, %c0_0] : memref<16x11xf32, #tpu.memory_space<vmem>>, vector<16x11xf32>
    %1 = tpu.transpose %0, [1, 0] : vector<16x11xf32> -> vector<11x16xf32>
    %2 = tpu.iota {dimensions = array<i32: 0>} : vector<11x16xi32>
    %c1_i32 = arith.constant 1 : i32
    %3 = vector.broadcast %c1_i32 : i32 to vector<11x16xi32>
    %4 = arith.cmpi sge, %2, %3 : vector<11x16xi32>
    %cst = arith.constant 0xFF800000 : f32
    %5 = vector.broadcast %cst : f32 to vector<11x16xf32>
    %6 = arith.select %4, %1, %5 : vector<11x16xi1>, vector<11x16xf32>
    %cst_1 = arith.constant dense<0xFF800000> : vector<16xf32>
    %7 = vector.multi_reduction <maximumf>, %6, %cst_1 [0] : vector<11x16xf32> to vector<16xf32>
    %8 = vector.shape_cast %7 : vector<16xf32> to vector<1x16xf32>
    %9 = arith.sitofp %2 : vector<11x16xi32> to vector<11x16xf32>
    %cst_2 = arith.constant 1.000000e-01 : f32
    %10 = vector.broadcast %cst_2 : f32 to vector<11x16xf32>
    %11 = arith.mulf %10, %9 : vector<11x16xf32>
    %cst_3 = arith.constant -5.000000e-02 : f32
    %12 = vector.broadcast %cst_3 : f32 to vector<11x16xf32>
    %13 = arith.addf %11, %12 : vector<11x16xf32>
    %14 = vector.broadcast %8 : vector<1x16xf32> to vector<11x16xf32>
    %15 = arith.cmpf oeq, %1, %14 : vector<11x16xf32>
    %16 = arith.andi %4, %15 : vector<11x16xi1>
    %cst_4 = arith.constant 0x7F800000 : f32
    %17 = vector.broadcast %cst_4 : f32 to vector<11x16xf32>
    %18 = arith.select %16, %13, %17 : vector<11x16xi1>, vector<11x16xf32>
    %cst_5 = arith.constant dense<0x7F800000> : vector<16xf32>
    %19 = vector.multi_reduction <minimumf>, %18, %cst_5 [0] : vector<11x16xf32> to vector<16xf32>
    %20 = vector.shape_cast %19 : vector<16xf32> to vector<1x16xf32>
    %21 = vector.extract_strided_slice %1 {offsets = [0, 0], sizes = [1, 16], strides = [1, 1]} : vector<11x16xf32> to vector<1x16xf32>
    %cst_6 = arith.constant 2.000000e-01 : f32
    %22 = vector.broadcast %cst_6 : f32 to vector<1x16xf32>
    %23 = arith.mulf %21, %22 : vector<1x16xf32>
    %cst_7 = arith.constant -1.000000e-01 : f32
    %24 = vector.broadcast %cst_7 : f32 to vector<1x16xf32>
    %25 = arith.addf %23, %24 : vector<1x16xf32>
    %26 = arith.addf %25, %20 : vector<1x16xf32>
    %cst_8 = arith.constant 0.000000e+00 : f32
    %cst_9 = arith.constant 1.000000e+00 : f32
    %27 = vector.broadcast %cst_8 : f32 to vector<1x16xf32>
    %28 = arith.maximumf %27, %26 : vector<1x16xf32>
    %29 = vector.broadcast %cst_9 : f32 to vector<1x16xf32>
    %30 = arith.minimumf %29, %28 : vector<1x16xf32>
    %c0_10 = arith.constant 0 : index
    %c0_11 = arith.constant 0 : index
    %31 = vector.load %arg2[%c0_10, %c0_11] : memref<1x16xf32, #tpu.memory_space<vmem>>, vector<1x16xf32>
    tpu.vector_store %arg2[%c0_10, %c0_11], %30 {strides = array<i32>} : memref<1x16xf32, #tpu.memory_space<vmem>>, vector<1x16xf32>,
    return
  }
  func.func @transform_0(%arg0: i32) -> (i32, i32) {
    %c0_i32 = arith.constant 0 : i32
    %c0_i32_0 = arith.constant 0 : i32
    return %arg0, %c0_i32 : i32, i32
  }
  func.func @transform_1(%arg0: i32) -> (i32, i32) {
    %c0_i32 = arith.constant 0 : i32
    %c0_i32_0 = arith.constant 0 : i32
    return %c0_i32, %arg0 : i32, i32
  }
}

module attributes {stable_mosaic.version = 11 : i64} {
  func.func @_sigmoid_bin_kernel(%arg0: i32, %arg1: memref<11x16xf32, #tpu.memory_space<vmem>>, %arg2: memref<1x16xf32, #tpu.memory_space<vmem>>) attributes {dimension_semantics = [#tpu.dimension_semantics<parallel>], iteration_bounds = array<i64: 1>, scalar_prefetch = 0 : i64, scratch_operands = 0 : i64, tpu.core_type = #tpu.core_type<tc>, window_params = [{transform_indices = @transform_0, window_bounds = array<i64: 11, 16>}, {transform_indices = @transform_1, window_bounds = array<i64: 1, 16>}]} {
    %c0 = arith.constant 0 : index
    %c0_0 = arith.constant 0 : index
    %0 = vector.load %arg1[%c0, %c0_0] : memref<11x16xf32, #tpu.memory_space<vmem>>, vector<11x16xf32>
    %1 = tpu.iota {dimensions = array<i32: 0>} : vector<11x16xi32>
    %c1_i32 = arith.constant 1 : i32
    %2 = vector.broadcast %c1_i32 : i32 to vector<11x16xi32>
    %3 = arith.cmpi sge, %1, %2 : vector<11x16xi32>
    %cst = arith.constant 0xFF800000 : f32
    %4 = vector.broadcast %cst : f32 to vector<11x16xf32>
    %5 = arith.select %3, %0, %4 : vector<11x16xi1>, vector<11x16xf32>
    %cst_1 = arith.constant dense<0xFF800000> : vector<16xf32>
    %6 = vector.multi_reduction <maximumf>, %5, %cst_1 [0] : vector<11x16xf32> to vector<16xf32>
    %7 = vector.shape_cast %6 : vector<16xf32> to vector<1x16xf32>
    %8 = arith.sitofp %1 : vector<11x16xi32> to vector<11x16xf32>
    %cst_2 = arith.constant 1.000000e-01 : f32
    %9 = vector.broadcast %cst_2 : f32 to vector<11x16xf32>
    %10 = arith.mulf %9, %8 : vector<11x16xf32>
    %cst_3 = arith.constant -5.000000e-02 : f32
    %11 = vector.broadcast %cst_3 : f32 to vector<11x16xf32>
    %12 = arith.addf %10, %11 : vector<11x16xf32>
    %13 = vector.broadcast %7 : vector<1x16xf32> to vector<11x16xf32>
    %14 = arith.cmpf oeq, %0, %13 : vector<11x16xf32>
    %15 = arith.andi %3, %14 : vector<11x16xi1>
    %cst_4 = arith.constant 0x7F800000 : f32
    %16 = vector.broadcast %cst_4 : f32 to vector<11x16xf32>
    %17 = arith.select %15, %12, %16 : vector<11x16xi1>, vector<11x16xf32>
    %cst_5 = arith.constant dense<0x7F800000> : vector<16xf32>
    %18 = vector.multi_reduction <minimumf>, %17, %cst_5 [0] : vector<11x16xf32> to vector<16xf32>
    %19 = vector.shape_cast %18 : vector<16xf32> to vector<1x16xf32>
    %20 = vector.extract_strided_slice %0 {offsets = [0, 0], sizes = [1, 16], strides = [1, 1]} : vector<11x16xf32> to vector<1x16xf32>
    %cst_6 = arith.constant 2.000000e-01 : f32
    %21 = vector.broadcast %cst_6 : f32 to vector<1x16xf32>
    %22 = arith.mulf %20, %21 : vector<1x16xf32>
    %cst_7 = arith.constant -1.000000e-01 : f32
    %23 = vector.broadcast %cst_7 : f32 to vector<1x16xf32>
    %24 = arith.addf %22, %23 : vector<1x16xf32>
    %25 = arith.addf %24, %19 : vector<1x16xf32>
    %cst_8 = arith.constant 0.000000e+00 : f32
    %cst_9 = arith.constant 1.000000e+00 : f32
    %26 = vector.broadcast %cst_8 : f32 to vector<1x16xf32>
    %27 = arith.maximumf %26, %25 : vector<1x16xf32>
    %28 = vector.broadcast %cst_9 : f32 to vector<1x16xf32>
    %29 = arith.minimumf %28, %27 : vector<1x16xf32>
    %c0_10 = arith.constant 0 : index
    %c0_11 = arith.constant 0 : index
    %30 = vector.load %arg2[%c0_10, %c0_11] : memref<1x16xf32, #tpu.memory_space<vmem>>, vector<1x16xf32>
    tpu.vector_store %arg2[%c0_10, %c0_11], %29 {strides = array<i32>} : memref<1x16xf32, #tpu.memory_space<vmem>>, vector<1x16xf32>,
    return
  }
  func.func @transform_0(%arg0: i32) -> (i32, i32) {
    %c0_i32 = arith.constant 0 : i32
    %c0_i32_0 = arith.constant 0 : i32
    return %c0_i32, %arg0 : i32, i32
  }
  func.func @transform_1(%arg0: i32) -> (i32, i32) {
    %c0_i32 = arith.constant 0 : i32
    %c0_i32_0 = arith.constant 0 : i32
    return %c0_i32, %arg0 : i32, i32
  }
}

</mosaic_0001>

<bundles_post_ra>
// kernel: tpu_custom_call.1
= control target key start
LH: loop header
LB: loop body
LE: loop exit
PB: predicated region body
PF: predicated region fallthrough
CT: control target
= control target key end

     0   :  { %6 = vsyncpa [#allocation3], 0  ;;  %s205_s0 = inlined_call_operand.hbm [shape: f32[16,11], index: 0, kind: input, shape index: {}]   ;;  %s206_s1 = inlined_call_operand.hbm [shape: f32[1,16], index: 1, kind: output, shape index: {}]  }
   0x1   :  { %7 = vsyncpa [#allocation4], 0  ;;  %s12_s8 = sshll.u32 %s205_s0, 4  ;;  %s179_s9 = smov [#allocation2]   ;;  %s13_s8 = int_to_ptr.hbm [resolvable:$true] %s12_s8 }
   0x2   :  { %s14_s10 = sshll.u32 %s179_s9, 4  ;;  %s180_s11 = smov 128   ;;  %s15_s10 = int_to_ptr.vmem [resolvable:$true] %s14_s10 }
   0x3   :  { %s181_s12 = smov 8  }
   0x4   :  { %20 = dma.hbm_to_vmem [thread:$0]  %s13_s8, 256, %s15_s10, [#allocation3], %s180_s11, %s180_s11, %s181_s12  }
   0x5   :  { %175 = dma.done.wait [#allocation3], 256  }
   0x6   :  { %176 = vsyncadd [#allocation3], 4294967040  ;;  %v25_v0 = vld [vmem:[#allocation2] sm:$0xff]  ;;  %v26_v1 = vld [vmem:[#allocation2 + $0x8] sm:$0xff]  ;;  %v59_v2 = vlaneseq  ;;  %vm66_vm1 = vcmask 130048   ;;  %vm68_vm2 = vcmask 124928  }
   0x7   :  { %27 = vxpose.xlu0.b32.start [1/2] (short) (narrow) %v25_v0, 16  ;;  %s182_s0 = smov [#allocation5]   ;;  %s112_s16 = sshll.u32 %s206_s1, 4  ;;  %vm103_vm6 = vcmask 122880   ;;  %s113_s16 = int_to_ptr.hbm [resolvable:$true] %s112_s16 }
   0x8   :  { %v60_v3 = vshrl.u32 %v59_v2, 7  ;;  %s110_s13 = sshll.u32 %s182_s0, 4  ;;  %s111_s13 = int_to_ptr.vmem [resolvable:$true] %s110_s13 }
   0xa   :  { %vm62_vm0 = vcmp.ge.s32.totalorder %v60_v3, 1  ;;  %v61_v7 = vadd.s32 8, %v60_v3  ;;  %v77_v13 = vcvt.s32.f32 %v60_v3 }
   0xc   :  { %v78_v12 = vcvt.s32.f32 %v61_v7  ;;  %v79_v17 = vmul.f32 0.1, %v77_v13 }
   0xe   :  { %v80_v16 = vmul.f32 0.1, %v78_v12  ;;  %v81_v21 = vadd.f32 -0.05, %v79_v17 }
   0xf   :  { %28 = vxpose.xlu0.b32.end [2/2] (short) (narrow) %v26_v1, 16 }
  0x10   :  { %v82_v20 = vadd.f32 -0.05, %v80_v16 }
  0xab   :  { %v43_v4 = vpop.trf.xlu0 }
  0xac   :  { %v64_v5 = vsel %vm62_vm0, %v43_v4, -inf  ;;  %v98_v31 = vmul.f32 0.2, %v43_v4 }
  0xad   :  { %v67_v8 = vsel %vm66_vm1, %v64_v5, -inf }
  0xae   :  { %v99_v34 = vadd.f32 -0.1, %v98_v31 }
  0xb3   :  { %v44_v6 = vpop.trf.xlu0 }
  0xb4   :  { %v69_v9 = vsel %vm68_vm2, %v44_v6, -inf }
  0xb5   :  { %v70_v10 = vmax.f32 %v67_v8, %v69_v9 }
  0xb7   :  { %v71_v11 = vrot.slane %v70_v10, 4 }
  0xb9   :  { %v72_v14 = vmax.f32 %v70_v10, %v71_v11 }
  0xbb   :  { %v73_v15 = vrot.slane %v72_v14, 2 }
  0xbd   :  { %v74_v18 = vmax.f32 %v72_v14, %v73_v15 }
  0xbf   :  { %v75_v19 = vrot.slane %v74_v18, 1 }
  0xc1   :  { %v76_v22 = vmax.f32 %v74_v18, %v75_v19 }
  0xc3   :  { %vm83_vm3 = vcmp.eq.f32.partialorder %v43_v4, %v76_v22  ;;  %vm84_vm4 = vcmp.eq.f32.partialorder %v44_v6, %v76_v22 }
  0xc4   :  { %vm85_vm5 = vmand %vm62_vm0, %vm83_vm3  ;;  %v88_v23 = vsel %vm84_vm4, %v82_v20, inf }
  0xc5   :  { %v87_v24 = vsel %vm85_vm5, %v81_v21, inf  ;;  %v90_v25 = vsel %vm68_vm2, %v88_v23, inf }
  0xc6   :  { %v89_v26 = vsel %vm66_vm1, %v87_v24, inf }
  0xc7   :  { %v91_v27 = vmin.f32 %v89_v26, %v90_v25 }
  0xc9   :  { %v92_v28 = vrot.slane %v91_v27, 4 }
  0xcb   :  { %v93_v29 = vmin.f32 %v91_v27, %v92_v28 }
  0xcd   :  { %v94_v30 = vrot.slane %v93_v29, 2 }
  0xcf   :  { %v95_v32 = vmin.f32 %v93_v29, %v94_v30 }
  0xd1   :  { %v96_v33 = vrot.slane %v95_v32, 1 }
  0xd3   :  { %v97_v35 = vmin.f32 %v95_v32, %v96_v33 }
  0xd5   :  { %v100_v36 = vadd.f32 %v99_v34, %v97_v35 }
  0xd7   :  { %v101_v37 = vmax.f32 %v100_v36, 0.0 }
  0xd9   :  { %v102_v38 = vmin.f32 %v101_v37, 1.0 }
  0xdb   :  { %104 = vst.msk [vmem:[#allocation5] sm:$0x1] %vm103_vm6, %v102_v38 }
  0xdc   :  { %115 = dma.vmem_to_hbm [thread:$0]  %s111_s13, 16, %s113_s16, [#allocation4]  }
  0xdd   :  { %177 = dma.done.wait [#allocation4], 16  }
  0xde   :  { %178 = vsyncadd [#allocation4], 4294967280 }
  0xdf   :  { %120 = vsyncpa [#allocation3], 1 }
  0xe0   :  { %121 = vsyncpa [#allocation4], 1 }

// kernel: tpu_custom_call.1
= control target key start
LH: loop header
LB: loop body
LE: loop exit
PB: predicated region body
PF: predicated region fallthrough
CT: control target
= control target key end

     0   :  { %6 = vsyncpa [#allocation3], 0  ;;  %s172_s0 = inlined_call_operand.hbm [shape: f32[11,16], index: 0, kind: input, shape index: {}]   ;;  %s173_s1 = inlined_call_operand.hbm [shape: f32[1,16], index: 1, kind: output, shape index: {}]  }
   0x1   :  { %7 = vsyncpa [#allocation4], 0  ;;  %s12_s8 = sshll.u32 %s172_s0, 4  ;;  %s146_s9 = smov [#allocation2]   ;;  %s13_s8 = int_to_ptr.hbm [resolvable:$true] %s12_s8 }
   0x2   :  { %s14_s10 = sshll.u32 %s146_s9, 4  ;;  %s147_s11 = smov 128   ;;  %s15_s10 = int_to_ptr.vmem [resolvable:$true] %s14_s10 }
   0x3   :  { %s148_s12 = smov 8  }
   0x4   :  { %20 = dma.hbm_to_vmem [thread:$0]  %s13_s8, 256, %s15_s10, [#allocation3], %s147_s11, %s147_s11, %s148_s12  }
   0x5   :  { %142 = dma.done.wait [#allocation3], 256  }
   0x6   :  { %143 = vsyncadd [#allocation3], 4294967040  ;;  %v27_v0 = vlaneseq  ;;  %vm36_vm1 = vcmask 124928   ;;  %vm34_vm2 = vcmask 130048   ;;  %v25_v2 = vld [vmem:[#allocation2] sm:$0xff]  ;;  %s149_s0 = smov [#allocation5]  }
   0x7   :  { %v26_v3 = vld [vmem:[#allocation2 + $0x8] sm:$0x7]  ;;  %v66_v29 = vmul.f32 0.2, %v25_v2  ;;  %s78_s13 = sshll.u32 %s149_s0, 4  ;;  %s80_s16 = sshll.u32 %s173_s1, 4  ;;  %s79_s13 = int_to_ptr.vmem [resolvable:$true] %s78_s13  ;;  %s81_s16 = int_to_ptr.hbm [resolvable:$true] %s80_s16 }
   0x8   :  { %v28_v1 = vshrl.u32 %v27_v0, 7  ;;  %v37_v5 = vsel %vm36_vm1, %v26_v3, -inf  ;;  %vm71_vm6 = vcmask 122880  }
   0x9   :  { %v67_v32 = vadd.f32 -0.1, %v66_v29 }
   0xa   :  { %vm30_vm0 = vcmp.ge.s32.totalorder %v28_v1, 1  ;;  %v29_v6 = vadd.s32 8, %v28_v1  ;;  %v45_v12 = vcvt.s32.f32 %v28_v1 }
   0xb   :  { %v32_v4 = vsel %vm30_vm0, %v25_v2, -inf }
   0xc   :  { %v35_v7 = vsel %vm34_vm2, %v32_v4, -inf  ;;  %v46_v10 = vcvt.s32.f32 %v29_v6  ;;  %v47_v16 = vmul.f32 0.1, %v45_v12 }
   0xd   :  { %v38_v8 = vmax.f32 %v35_v7, %v37_v5 }
   0xe   :  { %v48_v14 = vmul.f32 0.1, %v46_v10  ;;  %v49_v20 = vadd.f32 -0.05, %v47_v16 }
   0xf   :  { %v39_v9 = vrot.slane %v38_v8, 4 }
  0x10   :  { %v50_v18 = vadd.f32 -0.05, %v48_v14 }
  0x11   :  { %v40_v11 = vmax.f32 %v38_v8, %v39_v9 }
  0x13   :  { %v41_v13 = vrot.slane %v40_v11, 2 }
  0x15   :  { %v42_v15 = vmax.f32 %v40_v11, %v41_v13 }
  0x17   :  { %v43_v17 = vrot.slane %v42_v15, 1 }
  0x19   :  { %v44_v19 = vmax.f32 %v42_v15, %v43_v17 }
  0x1b   :  { %vm51_vm3 = vcmp.eq.f32.partialorder %v25_v2, %v44_v19  ;;  %vm52_vm4 = vcmp.eq.f32.partialorder %v26_v3, %v44_v19 }
  0x1c   :  { %vm53_vm5 = vmand %vm30_vm0, %vm51_vm3  ;;  %v56_v21 = vsel %vm52_vm4, %v50_v18, inf }
  0x1d   :  { %v55_v22 = vsel %vm53_vm5, %v49_v20, inf  ;;  %v58_v23 = vsel %vm36_vm1, %v56_v21, inf }
  0x1e   :  { %v57_v24 = vsel %vm34_vm2, %v55_v22, inf }
  0x1f   :  { %v59_v25 = vmin.f32 %v57_v24, %v58_v23 }
  0x21   :  { %v60_v26 = vrot.slane %v59_v25, 4 }
  0x23   :  { %v61_v27 = vmin.f32 %v59_v25, %v60_v26 }
  0x25   :  { %v62_v28 = vrot.slane %v61_v27, 2 }
  0x27   :  { %v63_v30 = vmin.f32 %v61_v27, %v62_v28 }
  0x29   :  { %v64_v31 = vrot.slane %v63_v30, 1 }
  0x2b   :  { %v65_v33 = vmin.f32 %v63_v30, %v64_v31 }
  0x2d   :  { %v68_v34 = vadd.f32 %v67_v32, %v65_v33 }
  0x2f   :  { %v69_v35 = vmax.f32 %v68_v34, 0.0 }
  0x31   :  { %v70_v36 = vmin.f32 %v69_v35, 1.0 }
  0x33   :  { %72 = vst.msk [vmem:[#allocation5] sm:$0x1] %vm71_vm6, %v70_v36 }
  0x34   :  { %83 = dma.vmem_to_hbm [thread:$0]  %s79_s13, 16, %s81_s16, [#allocation4]  }
  0x35   :  { %144 = dma.done.wait [#allocation4], 16  }
  0x36   :  { %145 = vsyncadd [#allocation4], 4294967280 }
  0x37   :  { %88 = vsyncpa [#allocation3], 1 }
  0x38   :  { %89 = vsyncpa [#allocation4], 1 }

</bundles_post_ra>
